<compile_context>
chip_gen: v5e
topology: v5e:2x2
jax: 0.10.0
libtpu: 0.0.40
codegen_flags: <defaults>
</compile_context>

<pallas_src>
import math

import jax
import jax.numpy as jnp
import numpy as np
from jax.experimental import pallas as pl
from jax.experimental.pallas import tpu as pltpu


# ----------------------------------------------------------------------------
# Kernel
# ----------------------------------------------------------------------------
def _make_mha_kernel(n_heads, d_head, compute_dtype, scale):
    def kernel(q_ref, k_ref, v_ref, mb_ref,
               wqkv_ref, bqkv_ref, wo_ref, bo_ref,
               out_ref, attn_ref,
               k_sc, v_sc, ctx_sc):
        # Ref shapes (batch dim squeezed by BlockSpec):
        #   q_ref: (tq, D) bf16     k_ref / v_ref: (Sk, D) bf16
        #   mb_ref: (1, Sk) or (tq, Sk) f32 additive bias (0 / -1e9)
        #   wqkv_ref: (3, D, D) bf16   bqkv_ref: (3, 1, D) f32
        #   wo_ref:   (D, D)    bf16   bo_ref:   (1, D)    f32
        #   out_ref:  (tq, D) f32      attn_ref: (H, tq, Sk)
        #   k_sc / v_sc: (Sk, D) bf16 scratch (persist across query tiles)
        #   ctx_sc:      (tq, D) bf16 scratch (concatenated heads)
        cd = compute_dtype

        # ---- K/V projections: full-width matmuls, only when batch changes ----
        @pl.when(pl.program_id(1) == 0)
        def _project_kv():
            kp = jnp.dot(k_ref[...], wqkv_ref[1],
                         preferred_element_type=jnp.float32) + bqkv_ref[1]
            vp = jnp.dot(v_ref[...], wqkv_ref[2],
                         preferred_element_type=jnp.float32) + bqkv_ref[2]
            k_sc[...] = kp.astype(cd)
            v_sc[...] = vp.astype(cd)

        # ---- Q projection: one full-width (tq, D) @ (D, D) matmul ----
        qp = jnp.dot(q_ref[...], wqkv_ref[0],
                     preferred_element_type=jnp.float32) + bqkv_ref[0]
        qb = (qp * scale).astype(cd)                       # (tq, D)

        kd = k_sc[...]                                     # (Sk, D)
        vd = v_sc[...]                                     # (Sk, D)
        mb = mb_ref[...]                                   # (1|tq, Sk) f32

        # ---- per-head attention (contraction width is d_head regardless) ----
        for h in range(n_heads):
            lo, hi = h * d_head, (h + 1) * d_head
            s = jnp.einsum("qd,kd->qk", qb[:, lo:hi], kd[:, lo:hi],
                           preferred_element_type=jnp.float32)       # (tq, Sk)
            s = s + mb
            s = s - jnp.max(s, axis=-1, keepdims=True)
            e = jnp.exp(s)
            p = e * pl.reciprocal(jnp.sum(e, axis=-1, keepdims=True),
                                  approx=True)
            attn_ref[h] = p.astype(attn_ref.dtype)
            ctx_sc[:, lo:hi] = jnp.dot(p.astype(cd), vd[:, lo:hi],
                                       preferred_element_type=jnp.float32
                                       ).astype(cd)

        # ---- output projection: one full-width matmul over concat-heads ----
        out = jnp.dot(ctx_sc[...], wo_ref[...],
                      preferred_element_type=jnp.float32) + bo_ref[...]
        out_ref[...] = out.astype(out_ref.dtype)

    return kernel


# ----------------------------------------------------------------------------
# Tiling / VMEM heuristics
# ----------------------------------------------------------------------------
def _pick_vmem_limit():
    phys = None
    try:
        phys = int(pltpu.get_tpu_info().vmem_capacity_bytes)
    except Exception:
        phys = None
    if phys is not None and phys >= 100 * (1 << 20):
        return 100 * (1 << 20)        # v5e / v6e: 128 MiB physical
    return 48 * (1 << 20)             # v7x (64 MiB physical) or unknown


def _pick_block_q(B, Sq, Sk, D, H, mq_full, attn_bytes, cb, budget, block_q):
    if block_q is not None:
        if Sq % block_q != 0:
            raise ValueError("block_q must divide the query sequence length")
        return block_q

    f32 = 4
    skp = max(Sk, 128)                # lane padding for f32 temporaries
    dp = max(D, 128)

    def est(tq):
        mq = tq if mq_full else 1
        fixed = (4 * Sk * D * cb                  # K,V input blocks (x2 buffers)
                 + 2 * Sk * D * cb                # K,V scratch
                 + 8 * D * D * cb                 # wqkv + wo, double-buffered
                 + 8 * D * f32)                   # biases
        per = (2 * tq * D * cb                    # Q input block
               + 2 * mq * skp * f32               # mask-bias block
               + 2 * tq * D * f32                 # output block
               + 2 * H * tq * Sk * attn_bytes     # attention-scores output block
               + 5 * max(tq, 8) * skp * f32       # live f32 softmax temporaries
               + 3 * max(tq, 8) * dp * f32        # projection / context temps
               + tq * D * cb)                     # ctx scratch
        return fixed + per

    # Candidates: multiples of 8 that divide Sq (full-Sq block always legal).
    cands = [c for c in (2048, 1024, 512, 256, 128, 64, 32, 16, 8)
             if c < Sq and Sq % c == 0]
    cands = [Sq] + cands
    # v7x has 2 TensorCores: if B == 1, prefer nq >= 2 over a single full tile.
    if B == 1 and len(cands) > 1:
        cands = cands[1:] + cands[:1]
    for tq in cands:
        if est(tq) <= budget:
            return tq
    return cands[-1]


# ----------------------------------------------------------------------------
# Wrapper
# ----------------------------------------------------------------------------
def multi_headed_attention_pallas(query, key, value, mask, params, n_heads, *,
                                  block_q=None,
                                  attn_dtype=jnp.bfloat16,
                                  compute_dtype=jnp.bfloat16):
    """Fused multi-head attention. Returns (output, attention_scores)."""
    B, Sq, D = query.shape
    Sk = key.shape[1]
    assert key.shape == value.shape and key.shape[0] == B and key.shape[2] == D
    assert D % n_heads == 0, "embedding size must be divisible by n_heads"
    dh = D // n_heads
    scale = 1.0 / math.sqrt(dh)

    # ---- mask -> additive f32 bias, computed once in the wrapper ----
    if mask is None:
        mbias = jnp.zeros((B, 1, 1, Sk), jnp.float32)
    else:
        mbias = jnp.where(mask != 0, jnp.float32(0.0), jnp.float32(-1e9))
        mbias = mbias.astype(jnp.float32)
    Mq = mbias.shape[2]
    assert Mq in (1, Sq), "mask must be (B,1,1,Sk) or (B,1,Sq,Sk)"

    vmem_limit = _pick_vmem_limit()
    budget = int(vmem_limit * 0.65)
    cb = jnp.dtype(compute_dtype).itemsize
    ab = jnp.dtype(attn_dtype).itemsize
    tq = _pick_block_q(B, Sq, Sk, D, n_heads, Mq == Sq, ab, cb, budget, block_q)
    nq = Sq // tq

    # ---- pack parameters: full-width (D, D) weights, no per-head split ----
    wqkv = jnp.stack([params["wq"], params["wk"], params["wv"]]
                     ).astype(compute_dtype)                         # (3, D, D)
    bqkv = jnp.stack([params["bq"], params["bk"], params["bv"]]
                     ).reshape(3, 1, D).astype(jnp.float32)          # (3, 1, D)
    wo = params["wo"].astype(compute_dtype)                          # (D, D)
    bo = params["bo"].reshape(1, D).astype(jnp.float32)              # (1, D)

    # bf16 inputs: halves K/V HBM reads and the double-buffered VMEM footprint
    q_in = query.astype(compute_dtype)
    k_in = key.astype(compute_dtype)
    v_in = value.astype(compute_dtype)

    if Mq == 1:
        mask_spec = pl.BlockSpec((None, None, 1, Sk), lambda b, qi: (b, 0, 0, 0))
    else:
        mask_spec = pl.BlockSpec((None, None, tq, Sk), lambda b, qi: (b, 0, qi, 0))

    in_specs = [
        pl.BlockSpec((None, tq, D), lambda b, qi: (b, qi, 0)),   # query tile
        pl.BlockSpec((None, Sk, D), lambda b, qi: (b, 0, 0)),    # key  (full)
        pl.BlockSpec((None, Sk, D), lambda b, qi: (b, 0, 0)),    # value(full)
        mask_spec,
        pl.BlockSpec((3, D, D), lambda b, qi: (0, 0, 0)),        # wqkv
        pl.BlockSpec((3, 1, D), lambda b, qi: (0, 0, 0)),        # bqkv
        pl.BlockSpec((D, D), lambda b, qi: (0, 0)),              # wo
        pl.BlockSpec((1, D), lambda b, qi: (0, 0)),              # bo
    ]
    out_specs = (
        pl.BlockSpec((None, tq, D), lambda b, qi: (b, qi, 0)),
        pl.BlockSpec((None, n_heads, tq, Sk), lambda b, qi: (b, 0, qi, 0)),
    )
    out_shape = (
        jax.ShapeDtypeStruct((B, Sq, D), jnp.float32),
        jax.ShapeDtypeStruct((B, n_heads, Sq, Sk), attn_dtype),
    )
    scratch_shapes = [
        pltpu.VMEM((Sk, D), compute_dtype),   # projected K (persists across qi)
        pltpu.VMEM((Sk, D), compute_dtype),   # projected V (persists across qi)
        pltpu.VMEM((tq, D), compute_dtype),   # concatenated-heads context
    ]

    kernel = _make_mha_kernel(n_heads, dh, compute_dtype, scale)
    out, attn = pl.pallas_call(
        kernel,
        grid=(B, nq),
        in_specs=in_specs,
        out_specs=out_specs,
        out_shape=out_shape,
        scratch_shapes=scratch_shapes,
        compiler_params=pltpu.CompilerParams(
            # batch parallel (v7x 2-TC split); qi arbitrary so K/V scratch
            # persists across query tiles of the same batch item.
            dimension_semantics=("parallel", "arbitrary"),
            vmem_limit_bytes=vmem_limit,
        ),
    )(q_in, k_in, v_in, mbias, wqkv, bqkv, wo, bo)
    return out, attn


# ----------------------------------------------------------------------------
# Pure-JAX reference (faithful to the PyTorch module)
# ----------------------------------------------------------------------------
def multi_headed_attention_ref(query, key, value, mask, params, n_heads):
    B, Sq, D = query.shape
    Sk = key.shape[1]
    dh = D // n_heads
    q = query @ params["wq"] + params["bq"]
    k = key @ params["wk"] + params["bk"]
    v = value @ params["wv"] + params["bv"]

    def split(t, S):
        return t.reshape(B, S, n_heads, dh).transpose(0, 2, 1, 3)

    qh, kh, vh = split(q, Sq), split(k, Sk), split(v, Sk)
    s = jnp.einsum("bhqd,bhkd->bhqk", qh, kh) / math.sqrt(dh)
    s = jnp.where(mask > 0.5, s, -1e9)
    s = s - jnp.max(s, axis=-1, keepdims=True)
    e = jnp.exp(s)
    attn = e / jnp.sum(e, axis=-1, keepdims=True)
    ctx = jnp.einsum("bhqk,bhkd->bhqd", attn, vh)
    ctx = ctx.transpose(0, 2, 1, 3).reshape(B, Sq, D)
    out = ctx @ params["wo"] + params["bo"]
    return out, attn


# ----------------------------------------------------------------------------
# Deterministic parameter init
# ----------------------------------------------------------------------------
def init_params(rng, d_model):
    ks = jax.random.split(rng, 8)
    wscale = 0.05

    def w(k, shape):
        return (wscale * jax.random.normal(k, shape)).astype(jnp.float32)

    return {
        "wq": w(ks[0], (d_model, d_model)), "bq": w(ks[4], (d_model,)),
        "wk": w(ks[1], (d_model, d_model)), "bk": w(ks[5], (d_model,)),
        "wv": w(ks[2], (d_model, d_model)), "bv": w(ks[6], (d_model,)),
        "wo": w(ks[3], (d_model, d_model)), "bo": w(ks[7], (d_model,)),
    }


if __name__ == "__main__":
    # Small, lane-friendly shapes: D = 128 (one full lane row), d_head = 32.
    batch, seq_len = 2, 16
    embedding_size, n_heads = 128, 4

    rng = jax.random.PRNGKey(0)
    kx, kp = jax.random.split(rng, 2)

    # self-attention inputs (query == key == value), encoder-style padding mask
    x = jax.random.normal(kx, (batch, seq_len, embedding_size), dtype=jnp.float32)
    mask_np = np.ones((batch, 1, 1, seq_len), dtype=np.float32)
    mask_np[1, 0, 0, -3:] = 0.0          # batch item 1: last 3 positions padded
    mask = jnp.asarray(mask_np)

    params = init_params(kp, embedding_size)
    out_ref, attn_expected = multi_headed_attention_ref(x, x, x, mask, params, n_heads)

    # 1) explicit block_q=8 -> grid (2, 2): exercises K/V persistence across qi
    out, attn = multi_headed_attention_pallas(
        x, x, x, mask, params, n_heads, block_q=8)
    out = jax.block_until_ready(out)
    attn = jax.block_until_ready(attn)

    attn_f32 = np.asarray(jnp.asarray(attn, dtype=jnp.float32))
    np.testing.assert_allclose(np.asarray(out), np.asarray(out_ref),
                               rtol=2e-2, atol=2e-2)
    np.testing.assert_allclose(attn_f32, np.asarray(attn_expected),
                               rtol=2e-2, atol=2e-2)
    assert out.shape == (batch, seq_len, embedding_size)
    assert attn.shape == (batch, n_heads, seq_len, seq_len)
    np.testing.assert_allclose(attn_f32.sum(-1), 1.0, rtol=1e-2, atol=1e-2)

    # 2) auto-picked tile (VMEM-aware) -> grid (2, 1)
    out2, attn2 = multi_headed_attention_pallas(x, x, x, mask, params, n_heads)
    out2 = jax.block_until_ready(out2)
    attn2 = jax.block_until_ready(attn2)
    np.testing.assert_allclose(np.asarray(out2), np.asarray(out_ref),
                               rtol=2e-2, atol=2e-2)
    np.testing.assert_allclose(np.asarray(jnp.asarray(attn2, dtype=jnp.float32)),
                               np.asarray(attn_expected), rtol=2e-2, atol=2e-2)

    print("KERNEL_OK")
</pallas_src>

<mosaic_0001>
module attributes {stable_mosaic.version = 11 : i64} {
  func.func @kernel(%arg0: i32, %arg1: i32, %arg2: memref<1x8x128xbf16, #tpu.memory_space<vmem>>, %arg3: memref<1x16x128xbf16, #tpu.memory_space<vmem>>, %arg4: memref<1x16x128xbf16, #tpu.memory_space<vmem>>, %arg5: memref<1x1x1x16xf32, #tpu.memory_space<vmem>>, %arg6: memref<3x128x128xbf16, #tpu.memory_space<vmem>>, %arg7: memref<3x1x128xf32, #tpu.memory_space<vmem>>, %arg8: memref<128x128xbf16, #tpu.memory_space<vmem>>, %arg9: memref<1x128xf32, #tpu.memory_space<vmem>>, %arg10: memref<1x8x128xf32, #tpu.memory_space<vmem>>, %arg11: memref<1x4x8x16xbf16, #tpu.memory_space<vmem>>, %arg12: memref<16x128xbf16, #tpu.memory_space<vmem>>, %arg13: memref<16x128xbf16, #tpu.memory_space<vmem>>, %arg14: memref<8x128xbf16, #tpu.memory_space<vmem>>) attributes {dimension_semantics = [#tpu.dimension_semantics<parallel>, #tpu.dimension_semantics<arbitrary>], iteration_bounds = array<i64: 2, 2>, scalar_prefetch = 0 : i64, scratch_operands = 3 : i64, tpu.core_type = #tpu.core_type<tc>, window_params = [{transform_indices = @transform_0, window_bounds = array<i64: 1, 8, 128>}, {transform_indices = @transform_1, window_bounds = array<i64: 1, 16, 128>}, {transform_indices = @transform_2, window_bounds = array<i64: 1, 16, 128>}, {transform_indices = @transform_3, window_bounds = array<i64: 1, 1, 1, 16>}, {pipeline_mode = #tpu.pipeline_mode<synchronous>, transform_indices = @transform_4, window_bounds = array<i64: 3, 128, 128>}, {pipeline_mode = #tpu.pipeline_mode<synchronous>, transform_indices = @transform_5, window_bounds = array<i64: 3, 1, 128>}, {pipeline_mode = #tpu.pipeline_mode<synchronous>, transform_indices = @transform_6, window_bounds = array<i64: 128, 128>}, {pipeline_mode = #tpu.pipeline_mode<synchronous>, transform_indices = @transform_7, window_bounds = array<i64: 1, 128>}, {transform_indices = @transform_8, window_bounds = array<i64: 1, 8, 128>}, {transform_indices = @transform_9, window_bounds = array<i64: 1, 4, 8, 16>}]} {
    %c0_i32 = arith.constant 0 : i32
    %0 = arith.cmpi eq, %arg1, %c0_i32 : i32
    %1 = arith.extui %0 : i1 to i32
    %c0_i32_0 = arith.constant 0 : i32
    %2 = arith.cmpi ne, %1, %c0_i32_0 : i32
    scf.if %2 {
      %c0_62 = arith.constant 0 : index
      %c0_63 = arith.constant 0 : index
      %c0_64 = arith.constant 0 : index
      %124 = vector.load %arg3[%c0_62, %c0_63, %c0_64] : memref<1x16x128xbf16, #tpu.memory_space<vmem>>, vector<1x16x128xbf16>
      %125 = vector.shape_cast %124 : vector<1x16x128xbf16> to vector<16x128xbf16>
      %c1_65 = arith.constant 1 : index
      %c0_66 = arith.constant 0 : index
      %c0_67 = arith.constant 0 : index
      %126 = vector.load %arg6[%c1_65, %c0_66, %c0_67] : memref<3x128x128xbf16, #tpu.memory_space<vmem>>, vector<1x128x128xbf16>
      %127 = vector.shape_cast %126 : vector<1x128x128xbf16> to vector<128x128xbf16>
      %cst_68 = arith.constant dense<0.000000e+00> : vector<16x128xf32>
      %128 = tpu.matmul %125, %127, %cst_68 {dimension_numbers = #tpu.dot_dimension_numbers<[1], [0], [0], [1], [0, 0, 1, 1], [], []>} : vector<16x128xbf16>, vector<128x128xbf16>, vector<16x128xf32> -> vector<16x128xf32>
      %c1_69 = arith.constant 1 : index
      %c0_70 = arith.constant 0 : index
      %c0_71 = arith.constant 0 : index
      %129 = vector.load %arg7[%c1_69, %c0_70, %c0_71] : memref<3x1x128xf32, #tpu.memory_space<vmem>>, vector<1x1x128xf32>
      %130 = vector.shape_cast %129 : vector<1x1x128xf32> to vector<1x128xf32>
      %131 = vector.broadcast %130 : vector<1x128xf32> to vector<16x128xf32>
      %132 = arith.addf %128, %131 : vector<16x128xf32>
      %c0_72 = arith.constant 0 : index
      %c0_73 = arith.constant 0 : index
      %c0_74 = arith.constant 0 : index
      %133 = vector.load %arg4[%c0_72, %c0_73, %c0_74] : memref<1x16x128xbf16, #tpu.memory_space<vmem>>, vector<1x16x128xbf16>
      %134 = vector.shape_cast %133 : vector<1x16x128xbf16> to vector<16x128xbf16>
      %c2_75 = arith.constant 2 : index
      %c0_76 = arith.constant 0 : index
      %c0_77 = arith.constant 0 : index
      %135 = vector.load %arg6[%c2_75, %c0_76, %c0_77] : memref<3x128x128xbf16, #tpu.memory_space<vmem>>, vector<1x128x128xbf16>
      %136 = vector.shape_cast %135 : vector<1x128x128xbf16> to vector<128x128xbf16>
      %cst_78 = arith.constant dense<0.000000e+00> : vector<16x128xf32>
      %137 = tpu.matmul %134, %136, %cst_78 {dimension_numbers = #tpu.dot_dimension_numbers<[1], [0], [0], [1], [0, 0, 1, 1], [], []>} : vector<16x128xbf16>, vector<128x128xbf16>, vector<16x128xf32> -> vector<16x128xf32>
      %c2_79 = arith.constant 2 : index
      %c0_80 = arith.constant 0 : index
      %c0_81 = arith.constant 0 : index
      %138 = vector.load %arg7[%c2_79, %c0_80, %c0_81] : memref<3x1x128xf32, #tpu.memory_space<vmem>>, vector<1x1x128xf32>
      %139 = vector.shape_cast %138 : vector<1x1x128xf32> to vector<1x128xf32>
      %140 = vector.broadcast %139 : vector<1x128xf32> to vector<16x128xf32>
      %141 = arith.addf %137, %140 : vector<16x128xf32>
      %142 = arith.truncf %132 : vector<16x128xf32> to vector<16x128xbf16>
      %c0_82 = arith.constant 0 : index
      %c0_83 = arith.constant 0 : index
      %143 = vector.load %arg12[%c0_82, %c0_83] : memref<16x128xbf16, #tpu.memory_space<vmem>>, vector<16x128xbf16>
      tpu.vector_store %arg12[%c0_82, %c0_83], %142 {strides = array<i32>} : memref<16x128xbf16, #tpu.memory_space<vmem>>, vector<16x128xbf16>,
      %144 = arith.truncf %141 : vector<16x128xf32> to vector<16x128xbf16>
      %c0_84 = arith.constant 0 : index
      %c0_85 = arith.constant 0 : index
      %145 = vector.load %arg13[%c0_84, %c0_85] : memref<16x128xbf16, #tpu.memory_space<vmem>>, vector<16x128xbf16>
      tpu.vector_store %arg13[%c0_84, %c0_85], %144 {strides = array<i32>} : memref<16x128xbf16, #tpu.memory_space<vmem>>, vector<16x128xbf16>,
    } else {
    }
    %c0 = arith.constant 0 : index
    %c0_1 = arith.constant 0 : index
    %c0_2 = arith.constant 0 : index
    %3 = vector.load %arg2[%c0, %c0_1, %c0_2] : memref<1x8x128xbf16, #tpu.memory_space<vmem>>, vector<1x8x128xbf16>
    %4 = vector.shape_cast %3 : vector<1x8x128xbf16> to vector<8x128xbf16>
    %c0_3 = arith.constant 0 : index
    %c0_4 = arith.constant 0 : index
    %c0_5 = arith.constant 0 : index
    %5 = vector.load %arg6[%c0_3, %c0_4, %c0_5] : memref<3x128x128xbf16, #tpu.memory_space<vmem>>, vector<1x128x128xbf16>
    %6 = vector.shape_cast %5 : vector<1x128x128xbf16> to vector<128x128xbf16>
    %cst = arith.constant dense<0.000000e+00> : vector<8x128xf32>
    %7 = tpu.matmul %4, %6, %cst {dimension_numbers = #tpu.dot_dimension_numbers<[1], [0], [0], [1], [0, 0, 1, 1], [], []>} : vector<8x128xbf16>, vector<128x128xbf16>, vector<8x128xf32> -> vector<8x128xf32>
    %c0_6 = arith.constant 0 : index
    %c0_7 = arith.constant 0 : index
    %c0_8 = arith.constant 0 : index
    %8 = vector.load %arg7[%c0_6, %c0_7, %c0_8] : memref<3x1x128xf32, #tpu.memory_space<vmem>>, vector<1x1x128xf32>
    %9 = vector.shape_cast %8 : vector<1x1x128xf32> to vector<1x128xf32>
    %10 = vector.broadcast %9 : vector<1x128xf32> to vector<8x128xf32>
    %11 = arith.addf %7, %10 : vector<8x128xf32>
    %cst_9 = arith.constant 0.176776692 : f32
    %12 = vector.broadcast %cst_9 : f32 to vector<8x128xf32>
    %13 = arith.mulf %11, %12 : vector<8x128xf32>
    %14 = arith.truncf %13 : vector<8x128xf32> to vector<8x128xbf16>
    %c0_10 = arith.constant 0 : index
    %c0_11 = arith.constant 0 : index
    %15 = vector.load %arg12[%c0_10, %c0_11] : memref<16x128xbf16, #tpu.memory_space<vmem>>, vector<16x128xbf16>
    %c0_12 = arith.constant 0 : index
    %c0_13 = arith.constant 0 : index
    %16 = vector.load %arg13[%c0_12, %c0_13] : memref<16x128xbf16, #tpu.memory_space<vmem>>, vector<16x128xbf16>
    %c0_14 = arith.constant 0 : index
    %c0_15 = arith.constant 0 : index
    %c0_16 = arith.constant 0 : index
    %c0_17 = arith.constant 0 : index
    %17 = vector.load %arg5[%c0_14, %c0_15, %c0_16, %c0_17] : memref<1x1x1x16xf32, #tpu.memory_space<vmem>>, vector<1x1x1x16xf32>
    %18 = vector.shape_cast %17 : vector<1x1x1x16xf32> to vector<1x16xf32>
    %19 = vector.extract_strided_slice %14 {offsets = [0, 0], sizes = [8, 32], strides = [1, 1]} : vector<8x128xbf16> to vector<8x32xbf16>
    %20 = vector.extract_strided_slice %15 {offsets = [0, 0], sizes = [16, 32], strides = [1, 1]} : vector<16x128xbf16> to vector<16x32xbf16>
    "tpu.trace_start"() <{level = 10 : i32, message = "qd,kd->qk"}> : () -> ()
    %cst_18 = arith.constant dense<0.000000e+00> : vector<8x16xf32>
    %21 = tpu.matmul %19, %20, %cst_18 {dimension_numbers = #tpu.dot_dimension_numbers<[1], [1], [0], [0], [0, 0, 1, 0], [], []>} : vector<8x32xbf16>, vector<16x32xbf16>, vector<8x16xf32> -> vector<8x16xf32>
    "tpu.trace_stop"() : () -> ()
    %22 = vector.broadcast %18 : vector<1x16xf32> to vector<8x16xf32>
    %23 = arith.addf %21, %22 : vector<8x16xf32>
    %cst_19 = arith.constant dense<0xFF800000> : vector<8xf32>
    %24 = vector.multi_reduction <maximumf>, %23, %cst_19 [1] : vector<8x16xf32> to vector<8xf32>
    %25 = vector.shape_cast %24 : vector<8xf32> to vector<8x1xf32>
    %26 = vector.broadcast %25 : vector<8x1xf32> to vector<8x16xf32>
    %27 = arith.subf %23, %26 : vector<8x16xf32>
    %28 = math.exp %27 : vector<8x16xf32>
    %cst_20 = arith.constant dense<0.000000e+00> : vector<8xf32>
    %29 = vector.multi_reduction <add>, %28, %cst_20 [1] : vector<8x16xf32> to vector<8xf32>
    %30 = vector.shape_cast %29 : vector<8xf32> to vector<8x1xf32>
    %31 = tpu.reciprocal %30 {approx = true} : vector<8x1xf32> -> vector<8x1xf32>
    %32 = vector.broadcast %31 : vector<8x1xf32> to vector<8x16xf32>
    %33 = arith.mulf %28, %32 : vector<8x16xf32>
    %34 = arith.truncf %33 : vector<8x16xf32> to vector<8x16xbf16>
    %c0_21 = arith.constant 0 : index
    %c0_22 = arith.constant 0 : index
    %c0_23 = arith.constant 0 : index
    %c0_24 = arith.constant 0 : index
    %35 = vector.load %arg11[%c0_21, %c0_22, %c0_23, %c0_24] : memref<1x4x8x16xbf16, #tpu.memory_space<vmem>>, vector<1x1x8x16xbf16>
    %36 = vector.shape_cast %35 : vector<1x1x8x16xbf16> to vector<8x16xbf16>
    %37 = vector.shape_cast %34 : vector<8x16xbf16> to vector<1x1x8x16xbf16>
    tpu.vector_store %arg11[%c0_21, %c0_22, %c0_23, %c0_24], %37 {strides = array<i32>} : memref<1x4x8x16xbf16, #tpu.memory_space<vmem>>, vector<1x1x8x16xbf16>,
    %38 = arith.truncf %33 : vector<8x16xf32> to vector<8x16xbf16>
    %39 = vector.extract_strided_slice %16 {offsets = [0, 0], sizes = [16, 32], strides = [1, 1]} : vector<16x128xbf16> to vector<16x32xbf16>
    %cst_25 = arith.constant dense<0.000000e+00> : vector<8x32xf32>
    %40 = tpu.matmul %38, %39, %cst_25 {dimension_numbers = #tpu.dot_dimension_numbers<[1], [0], [0], [1], [0, 0, 1, 1], [], []>} : vector<8x16xbf16>, vector<16x32xbf16>, vector<8x32xf32> -> vector<8x32xf32>
    %41 = arith.truncf %40 : vector<8x32xf32> to vector<8x32xbf16>
    %c0_26 = arith.constant 0 : index
    %c0_27 = arith.constant 0 : index
    %42 = vector.load %arg14[%c0_26, %c0_27] : memref<8x128xbf16, #tpu.memory_space<vmem>>, vector<8x32xbf16>
    tpu.vector_store %arg14[%c0_26, %c0_27], %41 {strides = array<i32>} : memref<8x128xbf16, #tpu.memory_space<vmem>>, vector<8x32xbf16>,
    %43 = vector.extract_strided_slice %14 {offsets = [0, 32], sizes = [8, 32], strides = [1, 1]} : vector<8x128xbf16> to vector<8x32xbf16>
    %44 = vector.extract_strided_slice %15 {offsets = [0, 32], sizes = [16, 32], strides = [1, 1]} : vector<16x128xbf16> to vector<16x32xbf16>
    "tpu.trace_start"() <{level = 10 : i32, message = "qd,kd->qk"}> : () -> ()
    %cst_28 = arith.constant dense<0.000000e+00> : vector<8x16xf32>
    %45 = tpu.matmul %43, %44, %cst_28 {dimension_numbers = #tpu.dot_dimension_numbers<[1], [1], [0], [0], [0, 0, 1, 0], [], []>} : vector<8x32xbf16>, vector<16x32xbf16>, vector<8x16xf32> -> vector<8x16xf32>
    "tpu.trace_stop"() : () -> ()
    %46 = vector.broadcast %18 : vector<1x16xf32> to vector<8x16xf32>
    %47 = arith.addf %45, %46 : vector<8x16xf32>
    %cst_29 = arith.constant dense<0xFF800000> : vector<8xf32>
    %48 = vector.multi_reduction <maximumf>, %47, %cst_29 [1] : vector<8x16xf32> to vector<8xf32>
    %49 = vector.shape_cast %48 : vector<8xf32> to vector<8x1xf32>
    %50 = vector.broadcast %49 : vector<8x1xf32> to vector<8x16xf32>
    %51 = arith.subf %47, %50 : vector<8x16xf32>
    %52 = math.exp %51 : vector<8x16xf32>
    %cst_30 = arith.constant dense<0.000000e+00> : vector<8xf32>
    %53 = vector.multi_reduction <add>, %52, %cst_30 [1] : vector<8x16xf32> to vector<8xf32>
    %54 = vector.shape_cast %53 : vector<8xf32> to vector<8x1xf32>
    %55 = tpu.reciprocal %54 {approx = true} : vector<8x1xf32> -> vector<8x1xf32>
    %56 = vector.broadcast %55 : vector<8x1xf32> to vector<8x16xf32>
    %57 = arith.mulf %52, %56 : vector<8x16xf32>
    %58 = arith.truncf %57 : vector<8x16xf32> to vector<8x16xbf16>
    %c0_31 = arith.constant 0 : index
    %c1 = arith.constant 1 : index
    %c0_32 = arith.constant 0 : index
    %c0_33 = arith.constant 0 : index
    %59 = vector.load %arg11[%c0_31, %c1, %c0_32, %c0_33] : memref<1x4x8x16xbf16, #tpu.memory_space<vmem>>, vector<1x1x8x16xbf16>
    %60 = vector.shape_cast %59 : vector<1x1x8x16xbf16> to vector<8x16xbf16>
    %61 = vector.shape_cast %58 : vector<8x16xbf16> to vector<1x1x8x16xbf16>
    tpu.vector_store %arg11[%c0_31, %c1, %c0_32, %c0_33], %61 {strides = array<i32>} : memref<1x4x8x16xbf16, #tpu.memory_space<vmem>>, vector<1x1x8x16xbf16>,
    %62 = arith.truncf %57 : vector<8x16xf32> to vector<8x16xbf16>
    %63 = vector.extract_strided_slice %16 {offsets = [0, 32], sizes = [16, 32], strides = [1, 1]} : vector<16x128xbf16> to vector<16x32xbf16>
    %cst_34 = arith.constant dense<0.000000e+00> : vector<8x32xf32>
    %64 = tpu.matmul %62, %63, %cst_34 {dimension_numbers = #tpu.dot_dimension_numbers<[1], [0], [0], [1], [0, 0, 1, 1], [], []>} : vector<8x16xbf16>, vector<16x32xbf16>, vector<8x32xf32> -> vector<8x32xf32>
    %65 = arith.truncf %64 : vector<8x32xf32> to vector<8x32xbf16>
    %c0_35 = arith.constant 0 : index
    %c32 = arith.constant 32 : index
    %66 = vector.load %arg14[%c0_35, %c32] : memref<8x128xbf16, #tpu.memory_space<vmem>>, vector<8x32xbf16>
    tpu.vector_store %arg14[%c0_35, %c32], %65 {strides = array<i32>} : memref<8x128xbf16, #tpu.memory_space<vmem>>, vector<8x32xbf16>,
    %67 = vector.extract_strided_slice %14 {offsets = [0, 64], sizes = [8, 32], strides = [1, 1]} : vector<8x128xbf16> to vector<8x32xbf16>
    %68 = vector.extract_strided_slice %15 {offsets = [0, 64], sizes = [16, 32], strides = [1, 1]} : vector<16x128xbf16> to vector<16x32xbf16>
    "tpu.trace_start"() <{level = 10 : i32, message = "qd,kd->qk"}> : () -> ()
    %cst_36 = arith.constant dense<0.000000e+00> : vector<8x16xf32>
    %69 = tpu.matmul %67, %68, %cst_36 {dimension_numbers = #tpu.dot_dimension_numbers<[1], [1], [0], [0], [0, 0, 1, 0], [], []>} : vector<8x32xbf16>, vector<16x32xbf16>, vector<8x16xf32> -> vector<8x16xf32>
    "tpu.trace_stop"() : () -> ()
    %70 = vector.broadcast %18 : vector<1x16xf32> to vector<8x16xf32>
    %71 = arith.addf %69, %70 : vector<8x16xf32>
    %cst_37 = arith.constant dense<0xFF800000> : vector<8xf32>
    %72 = vector.multi_reduction <maximumf>, %71, %cst_37 [1] : vector<8x16xf32> to vector<8xf32>
    %73 = vector.shape_cast %72 : vector<8xf32> to vector<8x1xf32>
    %74 = vector.broadcast %73 : vector<8x1xf32> to vector<8x16xf32>
    %75 = arith.subf %71, %74 : vector<8x16xf32>
    %76 = math.exp %75 : vector<8x16xf32>
    %cst_38 = arith.constant dense<0.000000e+00> : vector<8xf32>
    %77 = vector.multi_reduction <add>, %76, %cst_38 [1] : vector<8x16xf32> to vector<8xf32>
    %78 = vector.shape_cast %77 : vector<8xf32> to vector<8x1xf32>
    %79 = tpu.reciprocal %78 {approx = true} : vector<8x1xf32> -> vector<8x1xf32>
    %80 = vector.broadcast %79 : vector<8x1xf32> to vector<8x16xf32>
    %81 = arith.mulf %76, %80 : vector<8x16xf32>
    %82 = arith.truncf %81 : vector<8x16xf32> to vector<8x16xbf16>
    %c0_39 = arith.constant 0 : index
    %c2 = arith.constant 2 : index
    %c0_40 = arith.constant 0 : index
    %c0_41 = arith.constant 0 : index
    %83 = vector.load %arg11[%c0_39, %c2, %c0_40, %c0_41] : memref<1x4x8x16xbf16, #tpu.memory_space<vmem>>, vector<1x1x8x16xbf16>
    %84 = vector.shape_cast %83 : vector<1x1x8x16xbf16> to vector<8x16xbf16>
    %85 = vector.shape_cast %82 : vector<8x16xbf16> to vector<1x1x8x16xbf16>
    tpu.vector_store %arg11[%c0_39, %c2, %c0_40, %c0_41], %85 {strides = array<i32>} : memref<1x4x8x16xbf16, #tpu.memory_space<vmem>>, vector<1x1x8x16xbf16>,
    %86 = arith.truncf %81 : vector<8x16xf32> to vector<8x16xbf16>
    %87 = vector.extract_strided_slice %16 {offsets = [0, 64], sizes = [16, 32], strides = [1, 1]} : vector<16x128xbf16> to vector<16x32xbf16>
    %cst_42 = arith.constant dense<0.000000e+00> : vector<8x32xf32>
    %88 = tpu.matmul %86, %87, %cst_42 {dimension_numbers = #tpu.dot_dimension_numbers<[1], [0], [0], [1], [0, 0, 1, 1], [], []>} : vector<8x16xbf16>, vector<16x32xbf16>, vector<8x32xf32> -> vector<8x32xf32>
    %89 = arith.truncf %88 : vector<8x32xf32> to vector<8x32xbf16>
    %c0_43 = arith.constant 0 : index
    %c64 = arith.constant 64 : index
    %90 = vector.load %arg14[%c0_43, %c64] : memref<8x128xbf16, #tpu.memory_space<vmem>>, vector<8x32xbf16>
    tpu.vector_store %arg14[%c0_43, %c64], %89 {strides = array<i32>} : memref<8x128xbf16, #tpu.memory_space<vmem>>, vector<8x32xbf16>,
    %91 = vector.extract_strided_slice %14 {offsets = [0, 96], sizes = [8, 32], strides = [1, 1]} : vector<8x128xbf16> to vector<8x32xbf16>
    %92 = vector.extract_strided_slice %15 {offsets = [0, 96], sizes = [16, 32], strides = [1, 1]} : vector<16x128xbf16> to vector<16x32xbf16>
    "tpu.trace_start"() <{level = 10 : i32, message = "qd,kd->qk"}> : () -> ()
    %cst_44 = arith.constant dense<0.000000e+00> : vector<8x16xf32>
    %93 = tpu.matmul %91, %92, %cst_44 {dimension_numbers = #tpu.dot_dimension_numbers<[1], [1], [0], [0], [0, 0, 1, 0], [], []>} : vector<8x32xbf16>, vector<16x32xbf16>, vector<8x16xf32> -> vector<8x16xf32>
    "tpu.trace_stop"() : () -> ()
    %94 = vector.broadcast %18 : vector<1x16xf32> to vector<8x16xf32>
    %95 = arith.addf %93, %94 : vector<8x16xf32>
    %cst_45 = arith.constant dense<0xFF800000> : vector<8xf32>
    %96 = vector.multi_reduction <maximumf>, %95, %cst_45 [1] : vector<8x16xf32> to vector<8xf32>
    %97 = vector.shape_cast %96 : vector<8xf32> to vector<8x1xf32>
    %98 = vector.broadcast %97 : vector<8x1xf32> to vector<8x16xf32>
    %99 = arith.subf %95, %98 : vector<8x16xf32>
    %100 = math.exp %99 : vector<8x16xf32>
    %cst_46 = arith.constant dense<0.000000e+00> : vector<8xf32>
    %101 = vector.multi_reduction <add>, %100, %cst_46 [1] : vector<8x16xf32> to vector<8xf32>
    %102 = vector.shape_cast %101 : vector<8xf32> to vector<8x1xf32>
    %103 = tpu.reciprocal %102 {approx = true} : vector<8x1xf32> -> vector<8x1xf32>
    %104 = vector.broadcast %103 : vector<8x1xf32> to vector<8x16xf32>
    %105 = arith.mulf %100, %104 : vector<8x16xf32>
    %106 = arith.truncf %105 : vector<8x16xf32> to vector<8x16xbf16>
    %c0_47 = arith.constant 0 : index
    %c3 = arith.constant 3 : index
    %c0_48 = arith.constant 0 : index
    %c0_49 = arith.constant 0 : index
    %107 = vector.load %arg11[%c0_47, %c3, %c0_48, %c0_49] : memref<1x4x8x16xbf16, #tpu.memory_space<vmem>>, vector<1x1x8x16xbf16>
    %108 = vector.shape_cast %107 : vector<1x1x8x16xbf16> to vector<8x16xbf16>
    %109 = vector.shape_cast %106 : vector<8x16xbf16> to vector<1x1x8x16xbf16>
    tpu.vector_store %arg11[%c0_47, %c3, %c0_48, %c0_49], %109 {strides = array<i32>} : memref<1x4x8x16xbf16, #tpu.memory_space<vmem>>, vector<1x1x8x16xbf16>,
    %110 = arith.truncf %105 : vector<8x16xf32> to vector<8x16xbf16>
    %111 = vector.extract_strided_slice %16 {offsets = [0, 96], sizes = [16, 32], strides = [1, 1]} : vector<16x128xbf16> to vector<16x32xbf16>
    %cst_50 = arith.constant dense<0.000000e+00> : vector<8x32xf32>
    %112 = tpu.matmul %110, %111, %cst_50 {dimension_numbers = #tpu.dot_dimension_numbers<[1], [0], [0], [1], [0, 0, 1, 1], [], []>} : vector<8x16xbf16>, vector<16x32xbf16>, vector<8x32xf32> -> vector<8x32xf32>
    %113 = arith.truncf %112 : vector<8x32xf32> to vector<8x32xbf16>
    %c0_51 = arith.constant 0 : index
    %c96 = arith.constant 96 : index
    %114 = vector.load %arg14[%c0_51, %c96] : memref<8x128xbf16, #tpu.memory_space<vmem>>, vector<8x32xbf16>
    tpu.vector_store %arg14[%c0_51, %c96], %113 {strides = array<i32>} : memref<8x128xbf16, #tpu.memory_space<vmem>>, vector<8x32xbf16>,
    %c0_52 = arith.constant 0 : index
    %c0_53 = arith.constant 0 : index
    %115 = vector.load %arg14[%c0_52, %c0_53] : memref<8x128xbf16, #tpu.memory_space<vmem>>, vector<8x128xbf16>
    %c0_54 = arith.constant 0 : index
    %c0_55 = arith.constant 0 : index
    %116 = vector.load %arg8[%c0_54, %c0_55] : memref<128x128xbf16, #tpu.memory_space<vmem>>, vector<128x128xbf16>
    %cst_56 = arith.constant dense<0.000000e+00> : vector<8x128xf32>
    %117 = tpu.matmul %115, %116, %cst_56 {dimension_numbers = #tpu.dot_dimension_numbers<[1], [0], [0], [1], [0, 0, 1, 1], [], []>} : vector<8x128xbf16>, vector<128x128xbf16>, vector<8x128xf32> -> vector<8x128xf32>
    %c0_57 = arith.constant 0 : index
    %c0_58 = arith.constant 0 : index
    %118 = vector.load %arg9[%c0_57, %c0_58] : memref<1x128xf32, #tpu.memory_space<vmem>>, vector<1x128xf32>
    %119 = vector.broadcast %118 : vector<1x128xf32> to vector<8x128xf32>
    %120 = arith.addf %117, %119 : vector<8x128xf32>
    %c0_59 = arith.constant 0 : index
    %c0_60 = arith.constant 0 : index
    %c0_61 = arith.constant 0 : index
    %121 = vector.load %arg10[%c0_59, %c0_60, %c0_61] : memref<1x8x128xf32, #tpu.memory_space<vmem>>, vector<1x8x128xf32>
    %122 = vector.shape_cast %121 : vector<1x8x128xf32> to vector<8x128xf32>
    %123 = vector.shape_cast %120 : vector<8x128xf32> to vector<1x8x128xf32>
    tpu.vector_store %arg10[%c0_59, %c0_60, %c0_61], %123 {strides = array<i32>} : memref<1x8x128xf32, #tpu.memory_space<vmem>>, vector<1x8x128xf32>,
    return
  }
  func.func @transform_0(%arg0: i32, %arg1: i32) -> (i32, i32, i32) {
    %c0_i32 = arith.constant 0 : i32
    %c0_i32_0 = arith.constant 0 : i32
    return %arg0, %arg1, %c0_i32 : i32, i32, i32
  }
  func.func @transform_1(%arg0: i32, %arg1: i32) -> (i32, i32, i32) {
    %c0_i32 = arith.constant 0 : i32
    %c0_i32_0 = arith.constant 0 : i32
    %c0_i32_1 = arith.constant 0 : i32
    return %arg0, %c0_i32, %c0_i32_0 : i32, i32, i32
  }
  func.func @transform_2(%arg0: i32, %arg1: i32) -> (i32, i32, i32) {
    %c0_i32 = arith.constant 0 : i32
    %c0_i32_0 = arith.constant 0 : i32
    %c0_i32_1 = arith.constant 0 : i32
    return %arg0, %c0_i32, %c0_i32_0 : i32, i32, i32
  }
  func.func @transform_3(%arg0: i32, %arg1: i32) -> (i32, i32, i32, i32) {
    %c0_i32 = arith.constant 0 : i32
    %c0_i32_0 = arith.constant 0 : i32
    %c0_i32_1 = arith.constant 0 : i32
    %c0_i32_2 = arith.constant 0 : i32
    return %arg0, %c0_i32, %c0_i32_0, %c0_i32_1 : i32, i32, i32, i32
  }
  func.func @transform_4(%arg0: i32, %arg1: i32) -> (i32, i32, i32) {
    %c0_i32 = arith.constant 0 : i32
    %c0_i32_0 = arith.constant 0 : i32
    %c0_i32_1 = arith.constant 0 : i32
    %c0_i32_2 = arith.constant 0 : i32
    return %c0_i32, %c0_i32_0, %c0_i32_1 : i32, i32, i32
  }
  func.func @transform_5(%arg0: i32, %arg1: i32) -> (i32, i32, i32) {
    %c0_i32 = arith.constant 0 : i32
    %c0_i32_0 = arith.constant 0 : i32
    %c0_i32_1 = arith.constant 0 : i32
    %c0_i32_2 = arith.constant 0 : i32
    return %c0_i32, %c0_i32_0, %c0_i32_1 : i32, i32, i32
  }
  func.func @transform_6(%arg0: i32, %arg1: i32) -> (i32, i32) {
    %c0_i32 = arith.constant 0 : i32
    %c0_i32_0 = arith.constant 0 : i32
    %c0_i32_1 = arith.constant 0 : i32
    return %c0_i32, %c0_i32_0 : i32, i32
  }
  func.func @transform_7(%arg0: i32, %arg1: i32) -> (i32, i32) {
    %c0_i32 = arith.constant 0 : i32
    %c0_i32_0 = arith.constant 0 : i32
    %c0_i32_1 = arith.constant 0 : i32
    return %c0_i32, %c0_i32_0 : i32, i32
  }
  func.func @transform_8(%arg0: i32, %arg1: i32) -> (i32, i32, i32) {
    %c0_i32 = arith.constant 0 : i32
    %c0_i32_0 = arith.constant 0 : i32
    return %arg0, %arg1, %c0_i32 : i32, i32, i32
  }
  func.func @transform_9(%arg0: i32, %arg1: i32) -> (i32, i32, i32, i32) {
    %c0_i32 = arith.constant 0 : i32
    %c0_i32_0 = arith.constant 0 : i32
    %c0_i32_1 = arith.constant 0 : i32
    return %arg0, %c0_i32, %arg1, %c0_i32_0 : i32, i32, i32, i32
  }
}

</mosaic_0001>

<bundles_post_ra>
// kernel: tpu_custom_call.1
= control target key start
LH: loop header
LB: loop body
LE: loop exit
PB: predicated region body
PF: predicated region fallthrough
CT: control target
= control target key end

     0   :  { %s2628_s0 = inlined_call_operand.hbm [shape: bf16[2,16,128], index: 0, kind: input, shape index: {}]   ;;  %s2629_s1 = inlined_call_operand.hbm [shape: bf16[2,16,128], index: 1, kind: input, shape index: {}]   ;;  %s2630_s2 = inlined_call_operand.hbm [shape: bf16[2,16,128], index: 2, kind: input, shape index: {}]   ;;  %s2631_s3 = inlined_call_operand.hbm [shape: f32[2,1,1,16], index: 3, kind: input, shape index: {}]   ;;  %s2632_s4 = inlined_call_operand.hbm [shape: bf16[3,128,128], index: 4, kind: input, shape index: {}]   ;;  %s2633_s5 = inlined_call_operand.vmem [shape: f32[3,1,128], index: 5, kind: input, shape index: {}]   ;;  %s2634_s6 = inlined_call_operand.hbm [shape: bf16[128,128], index: 6, kind: input, shape index: {}]   ;;  %s2635_s7 = inlined_call_operand.vmem [shape: f32[1,128], index: 7, kind: input, shape index: {}]   ;;  %s2636_s8 = inlined_call_operand.hbm [shape: f32[2,16,128], index: 8, kind: output, shape index: {0}]   ;;  %s2637_s9 = inlined_call_operand.hbm [shape: bf16[2,4,16,16], index: 9, kind: output, shape index: {1}]  }
   0x1   :  { %2663 = sst [smem:[#allocation38_spill]] %s2628_s0 }
   0x2   :  { %2664 = sst [smem:[#allocation39_spill]] %s2629_s1 }
   0x3   :  { %2665 = sst [smem:[#allocation40_spill]] %s2630_s2 }
   0x4   :  { %2666 = sst [smem:[#allocation41_spill]] %s2631_s3 }
   0x5   :  { %2667 = sst [smem:[#allocation42_spill]] %s2632_s4 }
   0x6   :  { %2668 = sst [smem:[#allocation43_spill]] %s2633_s5 }
   0x7   :  { %2669 = sst [smem:[#allocation44_spill]] %s2634_s6 }
   0x8   :  { %2670 = sst [smem:[#allocation45_spill]] %s2635_s7 }
   0x9   :  { %2671 = sst [smem:[#allocation46_spill]] %s2636_s8 }
   0xa   :  { %2672 = sst [smem:[#allocation47_spill]] %s2637_s9 }
   0xb   :  { %15 = vsyncpa [#allocation6], 0 }
   0xc   :  { %17 = vsyncpa [#allocation6 + $0x1], 0 }
   0xd   :  { %18 = vsyncpa [#allocation9], 0 }
   0xe   :  { %20 = vsyncpa [#allocation9 + $0x1], 0 }
   0xf   :  { %21 = vsyncpa [#allocation12], 0 }
  0x10   :  { %23 = vsyncpa [#allocation12 + $0x1], 0 }
  0x11   :  { %24 = vsyncpa [#allocation15], 0 }
  0x12   :  { %25 = vsyncpa [#allocation7], 0 }
  0x13   :  { %27 = vsyncpa [#allocation7 + $0x1], 0 }
  0x14   :  { %28 = vsyncpa [#allocation18], 0 }
  0x15   :  { %30 = vsyncpa [#allocation18 + $0x1], 0  ;;  %s2220_s30 = smov 0   ;;  %s2222_s10 = smov 0  }
  0x16   :  { %s2224_s11 = smov 0   ;;  %s2226_s12 = smov 0  }
  0x17   :  { %s2228_s13 = smov 0   ;;  %s2230_s14 = smov 0  }
  0x18   :  { %s2232_s15 = smov 0   ;;  %s2234_s16 = smov 0  }
  0x19   :  { %s2236_s17 = smov 0   ;;  %s2238_s18 = smov 0  }
  0x1a   :  { %s2240_s19 = smov 0  }
  0x1b LB: > { %2673 = sst [smem:[#allocation26_spill]] %s2123_s10  ;;  %s2276_s20 = sadd.s32 4294967295, %s2159_s19   ;;  %s2159_s19 = sphi %s2240_s19, %s36_s19   ;;  %s2155_s18 = sphi %s2238_s18, %s2735_s18   ;;  %s2151_s17 = sphi %s2236_s17, %s2727_s17   ;;  %s2147_s16 = sphi %s2234_s16, %s2734_s16   ;;  %s2143_s15 = sphi %s2232_s15, %s2726_s15   ;;  %s2139_s14 = sphi %s2230_s14, %s2733_s14   ;;  %s2135_s13 = sphi %s2228_s13, %s2732_s13   ;;  %s2131_s12 = sphi %s2226_s12, %s2731_s12   ;;  %s2127_s11 = sphi %s2224_s11, %s2730_s11   ;;  %s2123_s10 = sphi %s2222_s10, %s2729_s10   ;;  %s2119_s30 = sphi %s2220_s30, %s2725_s30  }
  0x1c   : > { %2674 = sst [smem:[#allocation27_spill]] %s2131_s12  ;;  %p1403_p0 = scmp.ge.s32.totalorder %s2159_s19, 1 }
  0x1d   : > { %2675 = sst [smem:[#allocation28_spill]] %s2143_s15  ;;  %p2649_p1 = scmp.eq.s32.totalorder %s2276_s20, 0 }
  0x1e   : > { %2676 = sst [smem:[#allocation29_spill]] %s2147_s16  ;;  %p299_p2 = scmp.lt.s32.totalorder %s2159_s19, 5 }
  0x1f   : > { %2677 = sst [smem:[#allocation30_spill]] %s2151_s17  ;;  %s2161_s25 = smov [#allocation13]  }
  0x20   : > { %2678 = sst [smem:[#allocation31_spill]] %s2276_s20  ;;  %p2284_p3 = pnand %p1403_p0, %p299_p2 }
  0x21   : > { %s2679_s4 = sld [smem:[#allocation42_spill]]  ;;  %s312_s26 = sshll.u32 %s2161_s25, 4  ;;  %s313_s26 = int_to_ptr.vmem [resolvable:$true] %s312_s26 }
  0x22   : > { %p1658_p4 = pneg %p2284_p3  ;;  %s2639_s28 = smov 64  }
  0x23   : > { %s2641_s29 = smov 4   ;;  %p65_p6 = scmp.eq.s32.totalorder %s2159_s19, 0 }
  0x24   : > { %p2292_p5 = pnand %p1658_p4, %p2649_p1  ;;  %p90_p7 = scmp.ne.s32.totalorder %s2127_s11, %s2123_s10 }
  0x25   : > { %p96_p8 = scmp.ne.s32.totalorder %s2123_s10, %s2119_s30  ;;  %p2650_p9 = scmp.lt.s32.totalorder %s2159_s19, 4 }
  0x26   : > { %p92_p10 = por %p90_p7, %p65_p6  ;;  %s2645_s25 = sand.u32 1, %s2127_s11  }
  0x27   : > { %s310_s23 = sshll.u32 %s2679_s4, 4  ;;  %p2312_p11 = por %p96_p8, %p2649_p1  ;;  %s311_s23 = int_to_ptr.hbm [resolvable:$true] %s310_s23 }
  0x28   : > { %1661 = dma.hbm_to_vmem [thread:$0]  (!%p2292_p5), %s311_s23, 3072, %s313_s26, [#allocation12], %s2639_s28, %s2639_s28, %s2641_s29  }
  0x29   : > { %s2682_s22 = scalar_select %p2312_p11, 1, 0 }
  0x2a   : > { %s1410_s4 = sshll.u32 %s2645_s25, 3  ;;  %s1590_s7 = sshll.u32 %s2155_s18, 3 }
  0x2b   : > { %2683 = sst [smem:[#allocation32_spill]] %s2682_s22  ;;  %s371_s30 = scalar_lea.vmem [#allocation8], %s1410_s4 }
  0x2c   : > { %s2684_s1 = sld [smem:[#allocation39_spill]]  ;;  %s379_s29 = sshll.u32 %s371_s30, 4  ;;  %s380_s29 = int_to_ptr.vmem [resolvable:$true] %s379_s29 }
  0x2d   : > { %p2325_p12 = pnand %p2650_p9, %p92_p10  ;;  %s2686_s2 = sld [smem:[#allocation40_spill]] }
  0x2e   : > { %s393_s8 = scalar_lea.vmem [#allocation10], %s1410_s4  ;;  %s2688_s30 = sand.u32 1, %s2159_s19  }
  0x2f   : > { %s2332_s23 = sshll.u32 %s393_s8, 4  ;;  %s2689_s5 = smov 4  }
  0x30   : > { %2687 = sst [smem:[#allocation33_spill]] %s2332_s23  ;;  %s2690_s15 = smov 64  }
  0x31   : > { %s2691_s6 = sld [smem:[#allocation44_spill]]  ;;  %s2164_s16 = smov [#allocation14]  }
  0x32   : > { %s376_s26 = scalar_lea.hbm %s2684_s1, %s1590_s7  ;;  %s2336_s1 = scalar_lea.sflag [#allocation9], %s2688_s30 }
  0x33   : > { %s377_s28 = sshll.u32 %s376_s26, 4  ;;  %s398_s25 = scalar_lea.hbm %s2686_s2, %s1590_s7  ;;  %s378_s28 = int_to_ptr.hbm [resolvable:$true] %s377_s28 }
  0x34   : > { %s399_s26 = sshll.u32 %s398_s25, 4  ;;  %s329_s25 = sshll.u32 %s2164_s16, 4  ;;  %s2344_s26 = int_to_ptr.hbm [resolvable:$true] %s399_s26  ;;  %s330_s25 = int_to_ptr.vmem [resolvable:$true] %s329_s25 }
  0x35   : > { %1671 = dma.hbm_to_vmem [thread:$0]  (!%p2325_p12), %s378_s28, 128, %s380_s29, %s2336_s1, %s2690_s15, %s2690_s15, %s2689_s5  }
  0x36   : > { %s1402_s28 = sadd.s32 4294967294, %s2159_s19   ;;  %s45_s29 = sadd.s32 1, %s2151_s17 }
  0x37   : > { %s327_s9 = sshll.u32 %s2691_s6, 4  ;;  %s48_s8 = sadd.s32 1, %s2155_s18  ;;  %s328_s9 = int_to_ptr.hbm [resolvable:$true] %s327_s9 }
  0x38   : > { %1664 = dma.hbm_to_vmem [thread:$0]  (!%p2292_p5), %s328_s9, 1024, %s330_s25, [#allocation15], %s2690_s15, %s2690_s15, %s2689_s5  }
  0x39   : > { %p46_p13 = scmp.ge.s32.totalorder %s45_s29, 2  ;;  %s57_s30 = sadd.s32 1, %s2139_s14 }
  0x3a   : > { %p64_p0 = scmp.ne.s32.totalorder %s2139_s14, %s2135_s13  ;;  %p70_p2 = scmp.ne.s32.totalorder %s2135_s13, %s2131_s12 }
  0x3b   : > { %s2737_s29 = smov (%p46_p13, %s45_s29), 0  ;;  %s2739_s8 = smov (!%p46_p13, %s48_s8), %s2155_s18 }
  0x3c   : > { %2692 = sst [smem:[#allocation34_spill]] %s2737_s29  ;;  %s53_s27 = ssub.s32 %s2151_s17, %s2737_s29 }
  0x3d   : > { %p2370_p4 = por %p65_p6, %p64_p0  ;;  %p50_p5 = scmp.ge.s32.totalorder %s2739_s8, 2 }
  0x3e   : > { %p2379_p7 = por %p2649_p1, %p70_p2  ;;  %s83_s9 = sadd.s32 1, %s2127_s11 }
  0x3f   : > { %p258_p8 = scmp.eq.s32.totalorder %s2276_s20, 3  ;;  %s2741_s8 = smov (%p50_p5, %s2739_s8), 0 }
  0x40   : > { %2695 = sst [smem:[#allocation35_spill]] %s2741_s8  ;;  %p264_p6 = scmp.eq.s32.totalorder %s1402_s28, 3 }
  0x41   : > { %p2387_p10 = por %p258_p8, %p64_p0  ;;  %s52_s25 = ssub.s32 %s2155_s18, %s2741_s8 }
  0x42   : > { %s346_s23 = sand.u32 1, %s2139_s14   ;;  %s54_s2 = sor.u32 %s53_s27, %s52_s25 }
  0x43   : > { %s2696_s16 = scalar_select %p2387_p10, 1, 0 }
  0x44   : > { %p81_p13 = scmp.eq.s32.totalorder %s52_s25, 0  ;;  %p55_p1 = scmp.eq.s32.totalorder %s54_s2, 0 }
  0x45   : > { %2697 = sst [smem:[#allocation36_spill]] %s2696_s16  ;;  %p2397_p9 = por %p264_p6, %p70_p2 }
  0x46   : > { %s2700_s29 = sld [smem:[#allocation33_spill]]  ;;  %s1407_s8 = sshll.u32 %s346_s23, 2 }
  0x47   : > { %s2698_s6 = scalar_select %p2397_p9, 1, 0 }
  0x48   : > { %s2402_s22 = scalar_select %p81_p13, %s2127_s11, %s83_s9  }
  0x49   : > { %2699 = sst [smem:[#allocation37_spill]] %s2698_s6  ;;  %s1408_s16 = sshll.u32 %s2155_s18, 1 }
  0x4a   : > { %s2405_s28 = scalar_select %p55_p1, %s2139_s14, %s57_s30  }
  0x4b   : > { %s354_s27 = sadd.s32 %s2151_s17, %s1408_s16  ;;  %s350_s25 = scalar_lea.vmem [#allocation5], %s1407_s8 }
  0x4c   : > { %s360_s2 = sshll.u32 %s350_s25, 4  ;;  %s1409_s12 = sshll.u32 %s354_s27, 2  ;;  %s361_s2 = int_to_ptr.vmem [resolvable:$true] %s360_s2 }
  0x4d   : > { %s2701_s0 = sld [smem:[#allocation38_spill]]  ;;  %p2702_p0 = scmp.lt.s32.totalorder %s2159_s19, 4 }
  0x4e   : > { %s347_s30 = scalar_lea.sflag [#allocation6], %s346_s23  ;;  %s2703_s8 = int_to_ptr.vmem [resolvable:$true] %s2700_s29 }
  0x4f   : > { %p1666_p2 = pnand %p2702_p0, %p2370_p4  ;;  %s2704_s3 = sld [smem:[#allocation41_spill]] }
  0x50   : > { %1674 = dma.hbm_to_vmem [thread:$0]  (!%p2325_p12), %s2344_s26, 128, %s2703_s8, %s2336_s1, %s2690_s15, %s2690_s15, %s2689_s5  }
  0x51   : > { %s2705_s6 = sand.u32 1, %s2127_s11   ;;  %s2438_s1 = sand.u32 (!%p2284_p3), 1, %s2135_s13  }
  0x52   : > { %s414_s10 = scalar_lea.vmem [#allocation11], %s2705_s6  ;;  %s1417_s5 = sshll.u32 (!%p2284_p3), %s2438_s1, 2 }
  0x53   : > { %s356_s20 = scalar_lea.hbm %s2701_s0, %s1409_s12  ;;  %s421_s12 = sshll.u32 %s414_s10, 4  ;;  %s422_s12 = int_to_ptr.vmem [resolvable:$true] %s421_s12 }
  0x54   : > { %s358_s9 = sshll.u32 %s356_s20, 4  ;;  %s2706_s20 = sand.u32 1, %s2159_s19   ;;  %s359_s9 = int_to_ptr.hbm [resolvable:$true] %s358_s9 }
  0x55   : > { %1668 = dma.hbm_to_vmem [thread:$0]  (!%p1666_p2), %s359_s9, 64, %s361_s2, %s347_s30  }
  0x56   : > { %s417_s25 = scalar_lea.hbm %s2704_s3, %s2155_s18  ;;  %s412_s4 = scalar_lea.sflag [#allocation12], %s2706_s20 }
  0x57   : > { %s419_s17 = sshll.u32 %s417_s25, 4  ;;  %430 = sbr.rel (%p2284_p3) target bundleno = 1764 (0x6e4), region = 52  ;;  %s420_s17 = int_to_ptr.hbm [resolvable:$true] %s419_s17 }
  0x58   : > { %1677 = dma.hbm_to_vmem [thread:$0]  (!%p2325_p12), %s420_s17, 16, %s422_s12, %s412_s4  }
  0x59   : > { %s433_s15 = scalar_lea.sflag (!%p2284_p3), [#allocation6], %s2438_s1  ;;  %s2442_s23 = scalar_lea.vmem (!%p2284_p3), [#allocation5], %s1417_s5 }
  0x5c   : > { %2090 = dma.done.wait (%p2379_p7), %s433_s15, 64  }
  0x5d   : > { %2092 = vsyncadd (%p2379_p7), %s433_s15, 4294967232  ;;  %s2707_s21 = sld [smem:[#allocation31_spill]] }
  0x5e   : > { %s2708_s17 = sld [smem:[#allocation26_spill]] }
  0x63   : > { %s442_s24 = sand.u32 1, %s2707_s21  }
  0x64   : > { %s444_s29 = sand.u32 1, %s2708_s17   ;;  %s443_s9 = scalar_lea.sflag [#allocation9], %s442_s24 }
  0x65   : > { %s2450_s2 = sshll.u32 %s444_s29, 3 }
  0x66   : > { %s446_s30 = scalar_lea.vmem [#allocation8], %s2450_s2 }
  0x67   : > { %2094 = dma.done.wait (%p2312_p11), %s443_s9, 256  }
  0x68   : > { %2096 = vsyncadd (%p2312_p11), %s443_s9, 4294967040  ;;  %s456_s8 = scalar_lea.vmem [#allocation10], %s2450_s2  ;;  %s463_s7 = scalar_lea.sflag [#allocation12], %s442_s24 }
  0x69   : > { %s2458_s16 = scalar_lea.vmem [#allocation11], %s444_s29 }
  0x6a   : > { %2098 = dma.done.wait (%p2312_p11), %s463_s7, 16  }
  0x6b   : > { %2100 = vsyncadd (%p2312_p11), %s463_s7, 4294967280  ;;  %p2710_p1 = scmp.eq.s32.totalorder %s2707_s21, 0 }
  0x6d   : > { %2102 = dma.done.wait (%p2710_p1), [#allocation12], 3072   ;;  %p2711_p3 = pmov %p2710_p1 }
  0x6e   : > { %p2712_p12 = pmov %p2710_p1 }
  0x6f   : > { %2104 = vsyncadd (%p2711_p3), [#allocation12], 4294964224 }
  0x70   : > { %2106 = dma.done.wait (%p2712_p12), [#allocation15], 1024   ;;  %p2713_p4 = pmov %p2710_p1 }
  0x71   : > { %s1422_s27 = sshll.u32 %s2438_s1, 3  ;;  %s1423_s25 = sshll.u32 %s2438_s1, 4 }
  0x72   : > { %2108 = vsyncadd (%p2713_p4), [#allocation15], 4294966272  ;;  %s2474_s6 = scalar_lea.vmem [#allocation16], %s1422_s27  ;;  %s2476_s10 = scalar_lea.vmem [#allocation17], %s1423_s25 }
  0x73   : > { %s2714_s12 = sld [smem:[#allocation28_spill]] }
  0x79   : > { %p1424_p11 = scmp.ne.s32.totalorder %s2714_s12, 0 }
  0x7a   : > { %s2715_s5 = sld [smem:[#allocation43_spill]] (!%p1424_p11) }
  0x7b   : > { %534 = sbr.rel (%p1424_p11) target bundleno = 300 (0x12c), region = 80 }
  0x80   : > { %v1600_v0 = vld [vmem:[#allocation13 + $0x78] sm:$0xff]  ;;  %v1599_v2 = vld [vmem:[#allocation13 + $0x70] sm:$0xff]  ;;  %v1598_v4 = vld [vmem:[#allocation13 + $0x68] sm:$0xff] }
  0x81   : > { %v1609_v1 = vld [vmem:[#allocation13 + $0xb8] sm:$0xff]  ;;  %613 = vmatpush.bf16.msra.mxu0 %v1600_v0  ;;  %v1608_v3 = vld [vmem:[#allocation13 + $0xb0] sm:$0xff]  ;;  %v1607_v5 = vld [vmem:[#allocation13 + $0xa8] sm:$0xff] }
  0x82   : > { %705 = vmatpush.bf16.msra.mxu1 %v1609_v1  ;;  %v1597_v6 = vld [vmem:[#allocation13 + $0x60] sm:$0xff]  ;;  %v1596_v8 = vld [vmem:[#allocation13 + $0x58] sm:$0xff]  ;;  %v1595_v10 = vld [vmem:[#allocation13 + $0x50] sm:$0xff] }
  0x83   : > { %v1606_v7 = vld [vmem:[#allocation13 + $0xa0] sm:$0xff]  ;;  %v1605_v9 = vld [vmem:[#allocation13 + $0x98] sm:$0xff]  ;;  %v1604_v11 = vld [vmem:[#allocation13 + $0x90] sm:$0xff] }
  0x84   : > { %v1594_v12 = vld [vmem:[#allocation13 + $0x48] sm:$0xff]  ;;  %v1593_v14 = vld [vmem:[#allocation13 + $0x40] sm:$0xff] }
  0x85   : > { %614 = vmatpush.bf16.msra.mxu0 %v1599_v2  ;;  %v1603_v13 = vld [vmem:[#allocation13 + $0x88] sm:$0xff]  ;;  %v1602_v15 = vld [vmem:[#allocation13 + $0x80] sm:$0xff] }
  0x86   : > { %706 = vmatpush.bf16.msra.mxu1 %v1608_v3  ;;  %v1592_v16 = vld [vmem:[%s446_s30] sm:$0xff]  ;;  %v1601_v17 = vld [vmem:[%s456_s8] sm:$0xff] }
  0x87   : > { %v1788_v20 = vld [vmem:[%s2715_s5 + $0x1] ss:$0 sm:$0xff]  ;;  %v1789_v21 = vld [vmem:[%s2715_s5 + $0x2] ss:$0 sm:$0xff] }
  0x89   : > { %615 = vmatpush.bf16.msra.mxu0 %v1598_v4 }
  0x8a   : > { %707 = vmatpush.bf16.msra.mxu1 %v1607_v5 }
  0x8d   : > { %616 = vmatpush.bf16.msra.mxu0 %v1597_v6 }
  0x8e   : > { %708 = vmatpush.bf16.msra.mxu1 %v1606_v7 }
  0x91   : > { %617 = vmatpush.bf16.msra.mxu0 %v1596_v8 }
  0x92   : > { %709 = vmatpush.bf16.msra.mxu1 %v1605_v9 }
  0x95   : > { %618 = vmatpush.bf16.msra.mxu0 %v1595_v10 }
  0x96   : > { %710 = vmatpush.bf16.msra.mxu1 %v1604_v11 }
  0x99   : > { %619 = vmatpush.bf16.msra.mxu0 %v1594_v12 }
  0x9a   : > { %711 = vmatpush.bf16.msra.mxu1 %v1603_v13 }
  0x9d   : > { %620 = vmatpush.bf16.msra.mxu0 %v1593_v14 }
  0x9e   : > { %712 = vmatpush.bf16.msra.mxu1 %v1602_v15 }
  0xa0   : > { %621 = vmatmul.bf16.vlgmr.msra.gmra.mxu0 %v1592_v16 }
  0xa1   : > { %713 = vmatmul.bf16.vlgmr.msra.gmra.mxu1 %v1601_v17 }
 0x11d   : > { %v622_v18 = vpop.f32.mrf.mxu0 }
 0x11e   : > { %v714_v19 = vpop.f32.mrf.mxu1  ;;  %v623_v24 = vadd.f32 %v1788_v20, %v622_v18 }
 0x11f   : > { %v715_v25 = vadd.f32 %v1789_v21, %v714_v19 }
 0x125   : > { %v624_v22 = vpop.f32.mrf.mxu0 }
 0x126   : > { %v716_v23 = vpop.f32.mrf.mxu1  ;;  %v625_v26 = vadd.f32 %v1788_v20, %v624_v22 }
 0x127   : > { %v717_v27 = vadd.f32 %v1789_v21, %v716_v23 }
 0x128   : > { %v1631_v28 = vpack.c.bf16 %v625_v26, %v623_v24 }
 0x129   : > { %v1636_v29 = vpack.c.bf16 %v717_v27, %v715_v25 }
 0x12a   : > { %1632 = vst [vmem:[#allocation2] sm:$0xff] %v1631_v28  }
 0x12b   : > { %1637 = vst [vmem:[#allocation3] sm:$0xff] %v1636_v29  }
 0x12c PF: > { %v1617_v30 = vld [vmem:[#allocation13 + $0x38] sm:$0xff]  ;;  %v1616_v31 = vld [vmem:[#allocation13 + $0x30] sm:$0xff]  ;;  %s2165_s17 = smov 96   ;;  %v1615_v33 = vld [vmem:[#allocation13 + $0x28] sm:$0xff]  ;;  %vm824_vm0 = vcmask 261120   ;;  %s2716_s29 = sld [smem:[#allocation43_spill]] }
 0x12d   : > { %796 = vmatpush.bf16.msra.mxu0 %v1617_v30  ;;  %v1614_v34 = vld [vmem:[#allocation13 + $0x20] sm:$0xff]  ;;  %v1613_v35 = vld [vmem:[#allocation13 + $0x18] sm:$0xff]  ;;  %v1612_v36 = vld [vmem:[#allocation13 + $0x10] sm:$0xff]  ;;  %s2167_s2 = smov 32   ;;  %vm844_vm1 = vcmask 130048   ;;  %vm857_vm2 = vcmask 125952  }
 0x12e   : > { %v1611_v37 = vld [vmem:[#allocation13 + $0x8] sm:$0xff]  ;;  %v1610_v38 = vld [vmem:[#allocation13] sm:$0xff]  ;;  %v727_v39 = vld [vmem:[%s2442_s23] sm:$0xf]  ;;  %s2166_s23 = smov 64   ;;  %vm882_vm3 = vcmask 257024  }
 0x12f   : > { %v2511_v53 = vld [vmem:[%s2458_s16] ss:$0 sm:$0xff]  ;;  %vm948_vm4 = vcmask 519424   ;;  %vm1011_vm5 = vcmask 781824   ;;  %s2717_s9 = sld [smem:[#allocation29_spill]]  ;;  %vm1074_vm6 = vcmask 1044224  }
 0x130   : > { %s2718_s30 = sld [smem:[#allocation28_spill]]  ;;  %s1194_s5 = sshll.u32 %s2476_s10, 4  ;;  %s1195_s5 = int_to_ptr.vmem [resolvable:$true] %s1194_s5 }
 0x131   : > { %v2489_v32 = vld [vmem:[#allocation2] sm:$0xff]  ;;  %797 = vmatpush.bf16.msra.mxu0 %v1616_v31  ;;  %s2720_s20 = sld [smem:[#allocation47_spill]]  ;;  %s1165_s21 = scalar_lea.sflag [#allocation18], %s2438_s1 }
 0x132   : > { %889 = vrot.lane.b32.xlu0 %v2489_v32, %s2165_s17  ;;  %v829_v40 = vsel %vm824_vm0, %v2489_v32, 0  ;;  %v2496_v41 = vld [vmem:[#allocation3] sm:$0xff]  ;;  %v1790_v42 = vld [vmem:[%s2716_s29] ss:$0 sm:$0xff] }
 0x133   : > { %838 = vmatpush.bf16.xpose.msra.mxu1 %v829_v40  ;;  %875 = vmatpush.bf16.msra.mxu2 %v2496_v41 }
 0x135   : > { %798 = vmatpush.bf16.msra.mxu0 %v1615_v33  ;;  %s1586_s7 = sshll.u32 %s2717_s9, 3 }
 0x136   : > { %s1191_s16 = sadd.s32 %s2718_s30, %s1586_s7 }
 0x137   : > { %s1587_s27 = sshll.u32 %s1191_s16, 2 }
 0x138   : > { %s1193_s4 = scalar_lea.hbm %s2720_s20, %s1587_s27 }
 0x139   : > { %799 = vmatpush.bf16.msra.mxu0 %v1614_v34  ;;  %s1196_s15 = sshll.u32 %s1193_s4, 4  ;;  %s1197_s15 = int_to_ptr.hbm [resolvable:$true] %s1196_s15 }
 0x13d   : > { %800 = vmatpush.bf16.msra.mxu0 %v1613_v35 }
 0x141   : > { %801 = vmatpush.bf16.msra.mxu0 %v1612_v36 }
 0x145   : > { %802 = vmatpush.bf16.msra.mxu0 %v1611_v37 }
 0x149   : > { %803 = vmatpush.bf16.msra.mxu0 %v1610_v38 }
 0x14c   : > { %804 = vmatmul.bf16.vlgmr.msra.gmra.mxu0 %v727_v39 }
 0x1a4   : > { %v890_v46 = vpop.permute.xlu0 %889 }
 0x1a5   : > { %v895_v47 = vsel %vm824_vm0, %v890_v46, 0 }
 0x1a6   : > { %904 = vmatpush.bf16.xpose.msrb.mxu0 %v895_v47 }
 0x1c9   : > { %v805_v43 = vpop.f32.mrf.mxu0 }
 0x1ca   : > { %v806_v44 = vadd.f32 %v1790_v42, %v805_v43 }
 0x1cc   : > { %v809_v45 = vmul.f32 0.17677669, %v806_v44 }
 0x1ce   : > { %v810_v48 = vpack.c.bf16 %v809_v45, %v809_v45 }
 0x1d0   : > { %v885_v49 = vunpack.c.l.b16 %v810_v48  ;;  %1535 = vmatmul.msk.bf16.vlgmr.msra.gmra.mxu1 %vm824_vm0, %v810_v48 }
 0x1d1   : > { %v807_v50 = vpop.f32.mrf.mxu0 }
 0x1d2   : > { %v886_v51 = vpack.c.b16 %v885_v49, %v885_v49 }
 0x1d4   : > { %887 = vrot.lane.b32.xlu0 %v886_v51, %s2165_s17 }
 0x1dc   : > { %924 = vrot.lane.b32.xlu0 %v2496_v41, %s2165_s17 }
 0x1e4   : > { %950 = vrot.lane.b32.xlu0 %v886_v51, %s2166_s23 }
 0x1ec   : > { %1013 = vrot.lane.b32.xlu0 %v886_v51, %s2167_s2 }
 0x246   : > { %v888_v52 = vpop.permute.xlu0 %887 }
 0x247   : > { %1541 = vmatmul.msk.bf16.vlgmr.msrb.gmra.mxu0 %vm824_vm0, %v888_v52 }
 0x24d   : > { %v840_v54 = vpop.f32.mrf.mxu1 }
 0x24e   : > { %v841_v55 = vadd.f32 %v2511_v53, %v840_v54  ;;  %v925_v56 = vpop.permute.xlu0 %924 }
 0x24f   : > { %937 = vmatpush.bf16.msrb.mxu2 %v925_v56 }
 0x250   : > { %v845_v57 = vsel %vm844_vm1, %v841_v55, -inf }
 0x251   : > { %846 = vmax.xlane.f32.xlu1 %v845_v57 }
 0x255   : > { %v842_v58 = vpop.f32.mrf.mxu1 }
 0x256   : > { %v951_v15 = vpop.permute.xlu0 %950 }
 0x25e   : > { %v1014_v24 = vpop.permute.xlu0 %1013 }
 0x2c4   : > { %v906_v59 = vpop.f32.mrf.mxu0  ;;  %v847_v60 = vpop.xlane.xlu1 %846 }
 0x2c5   : > { %v907_v61 = vadd.f32 %v2511_v53, %v906_v59  ;;  %v848_v62 = vsub.f32 %v841_v55, %v847_v60 }
 0x2c7   : > { %v849_v63 = vmul.f32 1.442695, %v848_v62  ;;  %v910_v0 = vsel %vm844_vm1, %v907_v61, -inf  ;;  %v1626_v62 = vld [vmem:[#allocation14 + $0x30] sm:$0xff] }
 0x2c8   : > { %911 = vmax.xlane.f32.xlu1 %v910_v0  ;;  %v1624_v0 = vld [vmem:[#allocation14 + $0x20] sm:$0xff] }
 0x2c9   : > { %1793 = vpow2.f32 %v849_v63  ;;  %v1625_v63 = vld [vmem:[#allocation14 + $0x28] sm:$0xff] }
 0x2cc   : > { %v908_v1 = vpop.f32.mrf.mxu0 }
 0x2cd   : > { %v1623_v1 = vld [vmem:[#allocation14 + $0x18] sm:$0xff] }
 0x2cf   : > { %v1794_v2 = vpop.eup %1793 }
 0x2d0   : > { %v851_v3 = vsel %vm844_vm1, %v1794_v2, 0.0 }
 0x2d1   : > { %852 = vadd.xlane.f32.xlu2 %v851_v3  ;;  %v1622_v3 = vld [vmem:[#allocation14 + $0x10] sm:$0xff] }
 0x2e1   : > { %952 = vrot.lane.b32.xlu1 %v2489_v32, %s2166_s23 }
 0x33b   : > { %v912_v4 = vpop.xlane.xlu1 %911 }
 0x33c   : > { %v913_v5 = vsub.f32 %v907_v61, %v912_v4  ;;  %v1627_v61 = vld [vmem:[#allocation14 + $0x38] sm:$0xff] }
 0x33e   : > { %v914_v6 = vmul.f32 1.442695, %v913_v5 }
 0x340   : > { %1795 = vpow2.f32 %v914_v6 }
 0x344   : > { %v853_v7 = vpop.xlane.xlu2 %852 }
 0x345   : > { %1797 = vrcp.f32 %v853_v7  ;;  %v1621_v7 = vld [vmem:[#allocation14 + $0x8] sm:$0xff] }
 0x346   : > { %v1796_v8 = vpop.eup %1795 }
 0x347   : > { %v916_v9 = vsel %vm844_vm1, %v1796_v8, 0.0 }
 0x348   : > { %917 = vadd.xlane.f32.xlu2 %v916_v9 }
 0x34b   : > { %v1798_v10 = vpop.eup %1797 }
 0x34c   : > { %v855_v11 = vmul.f32 %v1798_v10, %v1794_v2 }
 0x34e   : > { %v856_v12 = vpack.c.bf16 %v855_v11, %v855_v11 }
 0x350   : > { %858 = vst.msk [vmem:[%s2476_s10] sm:$0xf] %vm857_vm2, %v856_v12  ;;  %1540 = vmatmul.msk.bf16.vlgmr.msra.gmra.mxu2 %vm844_vm1, %v856_v12 }
 0x353   : > { %v953_v13 = vpop.permute.xlu1 %952 }
 0x354   : > { %v958_v14 = vsel %vm824_vm0, %v953_v13, 0 }
 0x355   : > { %967 = vmatpush.bf16.xpose.msrb.mxu1 %v958_v14 }
 0x35c   : > { %1544 = vmatmul.msk.bf16.vlgmr.msrb.gmra.mxu1 %vm824_vm0, %v951_v15 }
 0x360   : > { %1015 = vrot.lane.b32.xlu2 %v2489_v32, %s2167_s2 }
 0x3bb   : > { %v918_v16 = vpop.xlane.xlu2 %917 }
 0x3bc   : > { %1799 = vrcp.f32 %v918_v16 }
 0x3c2   : > { %v1800_v17 = vpop.eup %1799 }
 0x3c3   : > { %v920_v18 = vmul.f32 %v1800_v17, %v1796_v8  ;;  %v1016_v19 = vpop.permute.xlu2 %1015  ;;  %v1620_v8 = vld [vmem:[#allocation14] sm:$0xff] }
 0x3c4   : > { %v1021_v20 = vsel %vm824_vm0, %v1016_v19, 0 }
 0x3c5   : > { %v921_v21 = vpack.c.bf16 %v920_v18, %v920_v18  ;;  %1030 = vmatpush.bf16.xpose.msra.mxu2 %v1021_v20 }
 0x3c7   : > { %1542 = vst.msk [vmem:[%s2476_s10 + $0x4] sm:$0xf] %vm857_vm2, %v921_v21  ;;  %1543 = vmatmul.msk.bf16.vlgmr.msrb.gmra.mxu2 %vm844_vm1, %v921_v21 }
 0x3d3   : > { %v877_v22 = vpop.f32.mrf.mxu2 }
 0x3d4   : > { %v881_v23 = vpack.c.bf16 %v877_v22, %v877_v22 }
 0x3d6   : > { %883 = vst.msk [vmem:[#allocation4] sm:$0xf] %vm882_vm3, %v881_v23 }
 0x3d7   : > { %1547 = vmatmul.msk.bf16.vlgmr.msra.gmra.mxu2 %vm824_vm0, %v1014_v24 }
 0x3d9   : > { %v969_v25 = vpop.f32.mrf.mxu1 }
 0x3da   : > { %v970_v26 = vadd.f32 %v2511_v53, %v969_v25 }
 0x3db   : > { %v879_v27 = vpop.f32.mrf.mxu2 }
 0x3dc   : > { %v973_v28 = vsel %vm844_vm1, %v970_v26, -inf }
 0x3dd   : > { %974 = vmax.xlane.f32.xlu0 %v973_v28 }
 0x3e1   : > { %v971_v29 = vpop.f32.mrf.mxu1 }
 0x3f1   : > { %987 = vrot.lane.b32.xlu0 %v2496_v41, %s2166_s23 }
 0x44a   : > { %v939_v30 = vpop.f32.mrf.mxu2 }
 0x44b   : > { %v943_v52 = vpack.c.bf16 %v939_v30, %v939_v30 }
 0x450   : > { %v975_v31 = vpop.xlane.xlu0 %974 }
 0x451   : > { %v976_v32 = vsub.f32 %v970_v26, %v975_v31 }
 0x452   : > { %v941_v33 = vpop.f32.mrf.mxu2 }
 0x453   : > { %v977_v34 = vmul.f32 1.442695, %v976_v32 }
 0x455   : > { %1801 = vpow2.f32 %v977_v34 }
 0x45a   : > { %v1032_v35 = vpop.f32.mrf.mxu2 }
 0x45b   : > { %v1802_v36 = vpop.eup %1801  ;;  %v1033_v37 = vadd.f32 %v2511_v53, %v1032_v35 }
 0x45c   : > { %v979_v38 = vsel %vm844_vm1, %v1802_v36, 0.0 }
 0x45d   : > { %980 = vadd.xlane.f32.xlu1 %v979_v38  ;;  %v1036_v39 = vsel %vm844_vm1, %v1033_v37, -inf }
 0x45e   : > { %1037 = vmax.xlane.f32.xlu2 %v1036_v39 }
 0x462   : > { %v1034_v40 = vpop.f32.mrf.mxu2 }
 0x463   : > { %v988_v42 = vpop.permute.xlu0 %987 }
 0x464   : > { %1000 = vmatpush.bf16.msra.mxu3 %v988_v42 }
 0x468   : > { %1145 = vmatpush.bf16.msrb.mxu3 %v1627_v61 }
 0x46c   : > { %1146 = vmatpush.bf16.msrb.mxu3 %v1626_v62 }
 0x470   : > { %1147 = vmatpush.bf16.msrb.mxu3 %v1625_v63 }
 0x474   : > { %1148 = vmatpush.bf16.msrb.mxu3 %v1624_v0 }
 0x476   : > { %1050 = vrot.lane.b32.xlu1 %v2496_v41, %s2167_s2 }
 0x478   : > { %1149 = vmatpush.bf16.msrb.mxu3 %v1623_v1 }
 0x47c   : > { %1150 = vmatpush.bf16.msrb.mxu3 %v1622_v3 }
 0x480   : > { %1151 = vmatpush.bf16.msrb.mxu3 %v1621_v7 }
 0x484   : > { %1152 = vmatpush.bf16.msrb.mxu3 %v1620_v8 }
 0x4d0   : > { %v981_v43 = vpop.xlane.xlu1 %980 }
 0x4d1   : > { %1803 = vrcp.f32 %v981_v43  ;;  %v1038_v44 = vpop.xlane.xlu2 %1037 }
 0x4d2   : > { %v1039_v45 = vsub.f32 %v1033_v37, %v1038_v44 }
 0x4d4   : > { %v1040_v46 = vmul.f32 1.442695, %v1039_v45 }
 0x4d6   : > { %1805 = vpow2.f32 %v1040_v46 }
 0x4d7   : > { %v1804_v47 = vpop.eup %1803 }
 0x4d8   : > { %v983_v48 = vmul.f32 %v1804_v47, %v1802_v36 }
 0x4da   : > { %v984_v49 = vpack.c.bf16 %v983_v48, %v983_v48 }
 0x4dc   : > { %v1806_v50 = vpop.eup %1805  ;;  %1545 = vst.msk [vmem:[%s2476_s10 + $0x8] sm:$0xf] %vm857_vm2, %v984_v49  ;;  %1546 = vmatmul.msk.bf16.vlgmr.msra.gmra.mxu3 %vm844_vm1, %v984_v49 }
 0x4dd   : > { %v1042_v51 = vsel %vm844_vm1, %v1806_v50, 0.0 }
 0x4de   : > { %1043 = vadd.xlane.f32.xlu2 %v1042_v51 }
 0x4e8   : > { %v1051_v41 = vpop.permute.xlu1 %1050 }
 0x4e9   : > { %1063 = vmatpush.bf16.msra.mxu1 %v1051_v41 }
 0x4f6   : > { %945 = vrot.lane.b32.xlu2 %v943_v52, %s2167_s2  ;;  %s2009_s2 = scalar_lea.hbm %s2720_s20, 64 }
 0x551   : > { %v1044_v53 = vpop.xlane.xlu2 %1043 }
 0x552   : > { %1807 = vrcp.f32 %v1044_v53 }
 0x558   : > { %v1808_v54 = vpop.eup %1807 }
 0x559   : > { %v1046_v55 = vmul.f32 %v1808_v54, %v1806_v50  ;;  %v946_v56 = vpop.permute.xlu2 %945 }
 0x55a   : > { %949 = vst.msk [vmem:[#allocation4] sm:$0xf] %vm948_vm4, %v946_v56 }
 0x55b   : > { %v1047_v57 = vpack.c.bf16 %v1046_v55, %v1046_v55 }
 0x55d   : > { %1548 = vst.msk [vmem:[%s2476_s10 + $0xc] sm:$0xf] %vm857_vm2, %v1047_v57  ;;  %1549 = vmatmul.msk.bf16.vlgmr.msra.gmra.mxu1 %vm844_vm1, %v1047_v57 }
 0x55f   : > { %v1002_v58 = vpop.f32.mrf.mxu3 }
 0x560   : > { %v1006_v59 = vpack.c.bf16 %v1002_v58, %v1002_v58 }
 0x562   : > { %1008 = vrot.lane.b32.xlu0 %v1006_v59, %s2166_s23 }
 0x567   : > { %v1004_v60 = vpop.f32.mrf.mxu3 }
 0x5d4   : > { %v1009_v2 = vpop.permute.xlu0 %1008 }
 0x5d5   : > { %1012 = vst.msk [vmem:[#allocation4] sm:$0xf] %vm1011_vm5, %v1009_v2 }
 0x5da   : > { %v1065_v4 = vpop.f32.mrf.mxu1 }
 0x5db   : > { %v1069_v5 = vpack.c.bf16 %v1065_v4, %v1065_v4 }
 0x5dd   : > { %1071 = vrot.lane.b32.xlu1 %v1069_v5, %s2165_s17  ;;  %s2003_s17 = sshra.s32 %s1197_s15, 4  ;;  %s2004_s17 = int_to_ptr.hbm [resolvable:$true] %s2003_s17 }
 0x5de   : > { %s2005_s26 = scalar_lea.hbm %s2004_s17, 16  ;;  %p2010_p6 = scmp.lt.s32.totalorder %s2004_s17, %s2720_s20 }
 0x5df   : > { %p2006_p5 = scmp.ne.s32.totalorder %s2004_s17, %s2005_s26  ;;  %p2011_p13 = scmp.lt.s32.totalorder %s2009_s2, %s2005_s26 }
 0x5e1   : > { %p2007_p7 = pnand %p2006_p5, %p2387_p10  ;;  %p2012_p0 = por %p2011_p13, %p2010_p6 }
 0x5e2   : > { %v1067_v6 = vpop.f32.mrf.mxu1 }
 0x5e3   : > { %p2008_p8 = pneg %p2007_p7 }
 0x5e5   : > { %p2013_p2 = pnand %p2012_p0, %p2008_p8 }
 0x64f   : > { %v1072_v9 = vpop.permute.xlu1 %1071 }
 0x650   : > { %1075 = vst.msk [vmem:[#allocation4] sm:$0xf] %vm1074_vm6, %v1072_v9 }
 0x657   : > { %v1076_v10 = vld [vmem:[#allocation4] sm:$0xf] }
 0x658   : > { %1153 = vmatmul.bf16.vlgmr.msrb.gmra.mxu3 %v1076_v10 }
 0x659   : > { %2016 = shalt.err (!%p2013_p2)
}
 0x65a   : > { %s2168_s10 = smov 128   ;;  %s2169_s27 = smov 4  }
 0x65b   : > { %1655 = dma.vmem_to_hbm [thread:$0]  (%p2387_p10), %s1195_s5, 256, %s1197_s15, %s1165_s21, %s2166_s23, %s2168_s10, %s2169_s27  }
 0x65c   : > { %s1584_s25 = sshll.u32 %s2717_s9, 1  ;;  %s2721_s24 = sld [smem:[#allocation46_spill]] }
 0x65d   : > { %s1175_s12 = sadd.s32 %s2718_s30, %s1584_s25  ;;  %s2722_s16 = sld [smem:[#allocation45_spill]] }
 0x65e   : > { %s1585_s4 = sshll.u32 %s1175_s12, 3  ;;  %s1179_s0 = sshll.u32 %s2474_s6, 4  ;;  %s1180_s0 = int_to_ptr.vmem [resolvable:$true] %s1179_s0 }
 0x65f   : > { %s1160_s23 = scalar_lea.sflag [#allocation7], %s2438_s1 }
 0x662   : > { %s1177_s29 = scalar_lea.hbm %s2721_s24, %s1585_s4  ;;  %s2037_s21 = scalar_lea.hbm %s2721_s24, 32 }
 0x663   : > { %v1792_v11 = vld [vmem:[%s2722_s16] ss:$0 sm:$0xff]  ;;  %s1181_s3 = sshll.u32 %s1177_s29, 4  ;;  %s1182_s3 = int_to_ptr.hbm [resolvable:$true] %s1181_s3 }
 0x664   : > { %s2031_s9 = sshra.s32 %s1182_s3, 4  ;;  %s2032_s9 = int_to_ptr.hbm [resolvable:$true] %s2031_s9 }
 0x665   : > { %s2033_s30 = scalar_lea.hbm %s2032_s9, 8  ;;  %p2038_p4 = scmp.lt.s32.totalorder %s2032_s9, %s2721_s24 }
 0x666   : > { %p2034_p1 = scmp.ne.s32.totalorder %s2032_s9, %s2033_s30  ;;  %p2039_p11 = scmp.lt.s32.totalorder %s2037_s21, %s2033_s30 }
 0x668   : > { %p2035_p3 = pnand %p2034_p1, %p2387_p10  ;;  %p2040_p5 = por %p2039_p11, %p2038_p4 }
 0x66a   : > { %p2036_p12 = pneg %p2035_p3 }
 0x66c   : > { %p2041_p7 = pnand %p2040_p5, %p2036_p12 }
 0x6db   : > { %v1154_v12 = vpop.f32.mrf.mxu3 }
 0x6dc   : > { %v1155_v13 = vadd.f32 %v1792_v11, %v1154_v12 }
 0x6de   : > { %1158 = vst [vmem:[%s2474_s6] sm:$0xff] %v1155_v13 }
 0x6df   : > { %2044 = shalt.err (!%p2041_p7)
}
 0x6e0   : > { %1654 = dma.vmem_to_hbm [thread:$0]  (%p2387_p10), %s1180_s0, 128, %s1182_s3, %s1160_s23  }
 0x6e3   : > { %v1156_v14 = vpop.f32.mrf.mxu3 }
 0x6e4 PF: > { %s2723_s1 = sld [smem:[#allocation27_spill]]  ;;  %p1690_p8 = scmp.ge.s32.totalorder %s2159_s19, 2 }
 0x6e6   : > { %p1679_p6 = pnand %p1690_p8, %p2397_p9 }
 0x6e8   : > { %p1680_p13 = pneg %p1679_p6 }
 0x6ea   : > { %s1211_s25 = sand.u32 1, %s2723_s1  }
 0x6eb   : > { %s1212_s12 = scalar_lea.sflag [#allocation7], %s1211_s25 }
 0x6ec   : > { %2110 = dma.done.wait (%p1680_p13), %s1212_s12, 128  }
 0x6ed   : > { %2112 = vsyncadd (%p1680_p13), %s1212_s12, 4294967168  ;;  %s1222_s4 = scalar_lea.sflag [#allocation18], %s1211_s25 }
 0x6ee   : > { %2114 = dma.done.wait (%p1680_p13), %s1222_s4, 256  }
 0x6ef   : > { %2116 = vsyncadd (%p1680_p13), %s1222_s4, 4294967040  ;;  %s36_s19 = sadd.s32 1, %s2159_s19   ;;  %s2725_s30 = sld [smem:[#allocation26_spill]] }
 0x6f0   : > { %p33_p0 = scmp.ge.s32.totalorder %s36_s19, 6   ;;  %s2726_s15 = sld [smem:[#allocation30_spill]] }
 0x6f1   : > { %s2727_s17 = sld [smem:[#allocation34_spill]]  ;;  %s2729_s10 = smov %s2127_s11 }
 0x6f2   : > { %s2728_s0 = sld [smem:[#allocation35_spill]]  ;;  %s2730_s11 = smov %s2402_s22 }
 0x6f3   : > { %s2731_s12 = smov %s2135_s13  ;;  %s2732_s13 = smov %s2139_s14 }
 0x6f4   : > { %s2733_s14 = smov %s2405_s28  ;;  %s2734_s16 = smov %s2155_s18 }
 0x6f5   :  { %35 = sbr.rel (!%p33_p0) target bundleno = 27 (0x1b), region = 170 }
 0x6f8   : > { %s2735_s18 = smov %s2728_s0 }
 0x6fa   :  { %1228 = vsyncpa [#allocation6], 1 }
 0x6fb   :  { %1230 = vsyncpa [#allocation6 + $0x1], 1 }
 0x6fc   :  { %1231 = vsyncpa [#allocation9], 1 }
 0x6fd   :  { %1233 = vsyncpa [#allocation9 + $0x1], 1 }
 0x6fe   :  { %1234 = vsyncpa [#allocation12], 1 }
 0x6ff   :  { %1236 = vsyncpa [#allocation12 + $0x1], 1 }
 0x700   :  { %1237 = vsyncpa [#allocation15], 1 }
 0x701   :  { %1238 = vsyncpa [#allocation7], 1 }
 0x702   :  { %1240 = vsyncpa [#allocation7 + $0x1], 1 }
 0x703   :  { %1241 = vsyncpa [#allocation18], 1 }
 0x704   :  { %1243 = vsyncpa [#allocation18 + $0x1], 1 }

</bundles_post_ra>
